<compile_context>
chip_gen: v7x
topology: tpu7x:2x2x1
jax: 0.10.0
libtpu: 0.0.40
codegen_flags: <defaults>
</compile_context>

<pallas_src>
import functools

import jax
import jax.numpy as jnp
from jax.experimental import pallas as pl
from jax.experimental.pallas import tpu as pltpu

IN_DIM = 93
OUT_DIM = 9
LAYER_DIMS = ((93, 80), (80, 64), (64, 32), (32, 9))  # (fan_in, fan_out) per layer
NUM_LAYERS = len(LAYER_DIMS)
PAD = 128  # lane-dense padded width for hidden dims / packed weights


def mlp_kernel(x_ref, w1_ref, w_ref, b_ref, o_ref):
    # x_ref : (TILE_B, 93) caller dtype (f32)  -- batch tile, pipelined over grid
    # w1_ref: (93, 128) bf16                   -- layer-1 weight, VMEM-resident
    # w_ref : (3, 128, 128) bf16               -- layers 2-4 weights (zero-padded)
    # b_ref : (4, 128) f32                     -- all biases (zero-padded)
    # o_ref : (TILE_B, 9) f32                  -- logits tile
    cd = w1_ref.dtype

    # Cast x in-kernel (VPU work hidden under the pipeline) so HBM only sees the
    # caller's dtype once.  Contracting dim is the real 93 columns, so there is
    # no padded-lane / undefined-data interaction.
    x = x_ref[...].astype(cd)

    # layer 1: (TILE_B, 93) @ (93, 128) -> f32, bias + ReLU
    h = jnp.dot(x, w1_ref[...], preferred_element_type=jnp.float32)
    h = jnp.maximum(h + b_ref[0:1, :], 0.0)

    # layer 2
    h = jnp.dot(h.astype(cd), w_ref[0], preferred_element_type=jnp.float32)
    h = jnp.maximum(h + b_ref[1:2, :], 0.0)

    # layer 3
    h = jnp.dot(h.astype(cd), w_ref[1], preferred_element_type=jnp.float32)
    h = jnp.maximum(h + b_ref[2:3, :], 0.0)

    # layer 4 (no activation); only the 9 real columns are written back
    h = jnp.dot(h.astype(cd), w_ref[2], preferred_element_type=jnp.float32)
    h = h + b_ref[3:4, :]
    o_ref[...] = h[:, :OUT_DIM].astype(o_ref.dtype)


def init_params(key):
    """Deterministic init matching the PyTorch module's shapes / layout."""
    params = {}
    for i, (fan_in, fan_out) in enumerate(LAYER_DIMS, start=1):
        key, kw, kb = jax.random.split(key, 3)
        bound = 1.0 / jnp.sqrt(fan_in)
        # PyTorch Linear weight layout: (out_features, in_features)
        params[f"w{i}"] = jax.random.uniform(
            kw, (fan_out, fan_in), jnp.float32, -bound, bound)
        params[f"b{i}"] = jax.random.uniform(
            kb, (fan_out,), jnp.float32, -bound, bound)
    return params


def prepare_params(params, compute_dtype=jnp.bfloat16):
    """One-time (init / checkpoint-load time) parameter packing.

    Layer 1 weight becomes its own (93, 128) operand (avoids a per-step VMEM
    slice/retile in the kernel); layers 2-4 are transposed to (in, out),
    zero-padded to (128, 128) and stacked; all biases are zero-padded to 128
    and stacked.  None of this is on the per-forward path.
    """
    fo1 = LAYER_DIMS[0][1]
    w1 = jnp.zeros((IN_DIM, PAD), compute_dtype)
    w1 = w1.at[:, :fo1].set(params["w1"].T.astype(compute_dtype))

    w_rest = jnp.zeros((NUM_LAYERS - 1, PAD, PAD), compute_dtype)
    b_packed = jnp.zeros((NUM_LAYERS, PAD), jnp.float32)
    b_packed = b_packed.at[0, :fo1].set(params["b1"].astype(jnp.float32))
    for idx in range(1, NUM_LAYERS):
        fan_in, fan_out = LAYER_DIMS[idx]
        w = params[f"w{idx + 1}"].T.astype(compute_dtype)   # (in, out)
        w_rest = w_rest.at[idx - 1, :fan_in, :fan_out].set(w)
        b_packed = b_packed.at[idx, :fan_out].set(
            params[f"b{idx + 1}"].astype(jnp.float32))
    return {"w1": w1, "w_rest": w_rest, "b_packed": b_packed}


def _round_up(x, m):
    return ((x + m - 1) // m) * m


def _choose_tile(B, max_tile):
    """Pick a batch tile: large tiles to amortize grid-step overhead, and an
    EVEN grid length (>= 2) for B > 512 so both v7x TensorCores get equal work."""
    if B <= 512:
        return B  # single tile; fixed pallas_call cost dominates at this size anyway
    n_steps = max(2, pl.cdiv(B, max_tile))
    if n_steps % 2:
        n_steps += 1
    tile = _round_up(pl.cdiv(B, n_steps), 8)
    return min(tile, B)


@functools.partial(jax.jit, static_argnames=("max_tile_b",))
def net_forward(x, packed, *, max_tile_b=4096):
    """Forward pass. `packed` comes from prepare_params (already (in,out)/padded/bf16)."""
    B, K = x.shape
    assert K == IN_DIM
    w1 = packed["w1"]
    w_rest = packed["w_rest"]
    b_packed = packed["b_packed"]

    # NOTE: x is deliberately NOT cast here; the kernel casts the tile to bf16
    # right before the layer-1 dot, so f32 callers pay one HBM read, not three.
    tile_b = _choose_tile(B, max_tile_b)
    grid = (pl.cdiv(B, tile_b),)

    flops = 2 * B * sum(fi * fo for fi, fo in LAYER_DIMS)
    bytes_accessed = (x.size * x.dtype.itemsize
                      + w1.size * w1.dtype.itemsize
                      + w_rest.size * w_rest.dtype.itemsize
                      + b_packed.size * b_packed.dtype.itemsize
                      + B * OUT_DIM * 4)

    return pl.pallas_call(
        mlp_kernel,
        out_shape=jax.ShapeDtypeStruct((B, OUT_DIM), jnp.float32),
        grid=grid,
        in_specs=[
            # batch tile of x, pipelined across the grid (caller dtype)
            pl.BlockSpec((tile_b, IN_DIM), lambda i: (i, 0)),
            # parameters: constant block index -> VMEM-resident, DMA'd once per call
            pl.BlockSpec((IN_DIM, PAD), lambda i: (0, 0)),
            pl.BlockSpec((NUM_LAYERS - 1, PAD, PAD), lambda i: (0, 0, 0)),
            pl.BlockSpec((NUM_LAYERS, PAD), lambda i: (0, 0)),
        ],
        out_specs=pl.BlockSpec((tile_b, OUT_DIM), lambda i: (i, 0)),
        compiler_params=pltpu.CompilerParams(
            dimension_semantics=("parallel",),
            vmem_limit_bytes=32 * 1024 * 1024),
        cost_estimate=pl.CostEstimate(
            flops=flops, transcendentals=0, bytes_accessed=bytes_accessed),
    )(x, w1, w_rest, b_packed)


def reference_forward_f32(x, params):
    """Plain f32 reference matching the PyTorch module exactly."""
    h = x.astype(jnp.float32)
    for i in (1, 2, 3):
        h = jnp.maximum(h @ params[f"w{i}"].T + params[f"b{i}"], 0.0)
    return h @ params["w4"].T + params["b4"]


def reference_forward_bf16(x, params, compute_dtype=jnp.bfloat16):
    """Reference mirroring the kernel's precision: bf16 operands, f32 accumulation."""
    h = x.astype(compute_dtype)
    for i in (1, 2, 3, 4):
        w = params[f"w{i}"].T.astype(compute_dtype)
        b = params[f"b{i}"].astype(jnp.float32)
        h = jnp.dot(h, w, preferred_element_type=jnp.float32) + b
        if i < 4:
            h = jnp.maximum(h, 0.0).astype(compute_dtype)
    return h


if __name__ == "__main__":
    key = jax.random.PRNGKey(0)
    kx, kp = jax.random.split(key)

    params = init_params(kp)
    packed = prepare_params(params)   # one-time packing, outside the forward path

    # Small batch (grid=1) and a medium batch that exercises the even-grid path
    # (600 rows -> two 304-row tiles, masked tail), keeping the demo shapes small.
    for B in (8, 600):
        kx, kxi = jax.random.split(kx)
        x = jax.random.normal(kxi, (B, IN_DIM), dtype=jnp.float32)

        out = net_forward(x, packed)
        out = jax.block_until_ready(out)
        assert out.shape == (B, OUT_DIM)

        ref_bf16 = reference_forward_bf16(x, params)
        ref_f32 = reference_forward_f32(x, params)
        assert jnp.allclose(out, ref_bf16, atol=1e-3, rtol=1e-3), (
            float(jnp.max(jnp.abs(out - ref_bf16))))
        # loose sanity check against the exact-f32 PyTorch semantics
        assert float(jnp.max(jnp.abs(out - ref_f32))) < 0.1, (
            float(jnp.max(jnp.abs(out - ref_f32))))

    print("KERNEL_OK")
</pallas_src>

<mosaic_0001>
module attributes {stable_mosaic.version = 11 : i64} {
  func.func @mlp_kernel(%arg0: i32, %arg1: memref<8x93xf32, #tpu.memory_space<vmem>>, %arg2: memref<93x128xbf16, #tpu.memory_space<vmem>>, %arg3: memref<3x128x128xbf16, #tpu.memory_space<vmem>>, %arg4: memref<4x128xf32, #tpu.memory_space<vmem>>, %arg5: memref<8x9xf32, #tpu.memory_space<vmem>>) attributes {dimension_semantics = [#tpu.dimension_semantics<parallel>], iteration_bounds = array<i64: 1>, scalar_prefetch = 0 : i64, scratch_operands = 0 : i64, tpu.core_type = #tpu.core_type<tc>, window_params = [{transform_indices = @transform_0, window_bounds = array<i64: 8, 93>}, {pipeline_mode = #tpu.pipeline_mode<synchronous>, transform_indices = @transform_1, window_bounds = array<i64: 93, 128>}, {pipeline_mode = #tpu.pipeline_mode<synchronous>, transform_indices = @transform_2, window_bounds = array<i64: 3, 128, 128>}, {pipeline_mode = #tpu.pipeline_mode<synchronous>, transform_indices = @transform_3, window_bounds = array<i64: 4, 128>}, {transform_indices = @transform_4, window_bounds = array<i64: 8, 9>}]} {
    %c0 = arith.constant 0 : index
    %c0_0 = arith.constant 0 : index
    %0 = vector.load %arg1[%c0, %c0_0] : memref<8x93xf32, #tpu.memory_space<vmem>>, vector<8x93xf32>
    %1 = arith.truncf %0 : vector<8x93xf32> to vector<8x93xbf16>
    %c0_1 = arith.constant 0 : index
    %c0_2 = arith.constant 0 : index
    %2 = vector.load %arg2[%c0_1, %c0_2] : memref<93x128xbf16, #tpu.memory_space<vmem>>, vector<93x128xbf16>
    %cst = arith.constant dense<0.000000e+00> : vector<8x128xf32>
    %3 = tpu.matmul %1, %2, %cst {dimension_numbers = #tpu.dot_dimension_numbers<[1], [0], [0], [1], [0, 0, 1, 1], [], []>} : vector<8x93xbf16>, vector<93x128xbf16>, vector<8x128xf32> -> vector<8x128xf32>
    %c0_3 = arith.constant 0 : index
    %c0_4 = arith.constant 0 : index
    %4 = vector.load %arg4[%c0_3, %c0_4] : memref<4x128xf32, #tpu.memory_space<vmem>>, vector<1x128xf32>
    %5 = vector.broadcast %4 : vector<1x128xf32> to vector<8x128xf32>
    %6 = arith.addf %3, %5 : vector<8x128xf32>
    %cst_5 = arith.constant 0.000000e+00 : f32
    %7 = vector.broadcast %cst_5 : f32 to vector<8x128xf32>
    %8 = arith.maximumf %6, %7 : vector<8x128xf32>
    %9 = arith.truncf %8 : vector<8x128xf32> to vector<8x128xbf16>
    %c0_6 = arith.constant 0 : index
    %c0_7 = arith.constant 0 : index
    %c0_8 = arith.constant 0 : index
    %10 = vector.load %arg3[%c0_6, %c0_7, %c0_8] : memref<3x128x128xbf16, #tpu.memory_space<vmem>>, vector<1x128x128xbf16>
    %11 = vector.shape_cast %10 : vector<1x128x128xbf16> to vector<128x128xbf16>
    %cst_9 = arith.constant dense<0.000000e+00> : vector<8x128xf32>
    %12 = tpu.matmul %9, %11, %cst_9 {dimension_numbers = #tpu.dot_dimension_numbers<[1], [0], [0], [1], [0, 0, 1, 1], [], []>} : vector<8x128xbf16>, vector<128x128xbf16>, vector<8x128xf32> -> vector<8x128xf32>
    %c1 = arith.constant 1 : index
    %c0_10 = arith.constant 0 : index
    %13 = vector.load %arg4[%c1, %c0_10] : memref<4x128xf32, #tpu.memory_space<vmem>>, vector<1x128xf32>
    %14 = vector.broadcast %13 : vector<1x128xf32> to vector<8x128xf32>
    %15 = arith.addf %12, %14 : vector<8x128xf32>
    %cst_11 = arith.constant 0.000000e+00 : f32
    %16 = vector.broadcast %cst_11 : f32 to vector<8x128xf32>
    %17 = arith.maximumf %15, %16 : vector<8x128xf32>
    %18 = arith.truncf %17 : vector<8x128xf32> to vector<8x128xbf16>
    %c1_12 = arith.constant 1 : index
    %c0_13 = arith.constant 0 : index
    %c0_14 = arith.constant 0 : index
    %19 = vector.load %arg3[%c1_12, %c0_13, %c0_14] : memref<3x128x128xbf16, #tpu.memory_space<vmem>>, vector<1x128x128xbf16>
    %20 = vector.shape_cast %19 : vector<1x128x128xbf16> to vector<128x128xbf16>
    %cst_15 = arith.constant dense<0.000000e+00> : vector<8x128xf32>
    %21 = tpu.matmul %18, %20, %cst_15 {dimension_numbers = #tpu.dot_dimension_numbers<[1], [0], [0], [1], [0, 0, 1, 1], [], []>} : vector<8x128xbf16>, vector<128x128xbf16>, vector<8x128xf32> -> vector<8x128xf32>
    %c2 = arith.constant 2 : index
    %c0_16 = arith.constant 0 : index
    %22 = vector.load %arg4[%c2, %c0_16] : memref<4x128xf32, #tpu.memory_space<vmem>>, vector<1x128xf32>
    %23 = vector.broadcast %22 : vector<1x128xf32> to vector<8x128xf32>
    %24 = arith.addf %21, %23 : vector<8x128xf32>
    %cst_17 = arith.constant 0.000000e+00 : f32
    %25 = vector.broadcast %cst_17 : f32 to vector<8x128xf32>
    %26 = arith.maximumf %24, %25 : vector<8x128xf32>
    %27 = arith.truncf %26 : vector<8x128xf32> to vector<8x128xbf16>
    %c2_18 = arith.constant 2 : index
    %c0_19 = arith.constant 0 : index
    %c0_20 = arith.constant 0 : index
    %28 = vector.load %arg3[%c2_18, %c0_19, %c0_20] : memref<3x128x128xbf16, #tpu.memory_space<vmem>>, vector<1x128x128xbf16>
    %29 = vector.shape_cast %28 : vector<1x128x128xbf16> to vector<128x128xbf16>
    %cst_21 = arith.constant dense<0.000000e+00> : vector<8x128xf32>
    %30 = tpu.matmul %27, %29, %cst_21 {dimension_numbers = #tpu.dot_dimension_numbers<[1], [0], [0], [1], [0, 0, 1, 1], [], []>} : vector<8x128xbf16>, vector<128x128xbf16>, vector<8x128xf32> -> vector<8x128xf32>
    %c3 = arith.constant 3 : index
    %c0_22 = arith.constant 0 : index
    %31 = vector.load %arg4[%c3, %c0_22] : memref<4x128xf32, #tpu.memory_space<vmem>>, vector<1x128xf32>
    %32 = vector.broadcast %31 : vector<1x128xf32> to vector<8x128xf32>
    %33 = arith.addf %30, %32 : vector<8x128xf32>
    %34 = vector.extract_strided_slice %33 {offsets = [0, 0], sizes = [8, 9], strides = [1, 1]} : vector<8x128xf32> to vector<8x9xf32>
    %c0_23 = arith.constant 0 : index
    %c0_24 = arith.constant 0 : index
    %35 = vector.load %arg5[%c0_23, %c0_24] : memref<8x9xf32, #tpu.memory_space<vmem>>, vector<8x9xf32>
    tpu.vector_store %arg5[%c0_23, %c0_24], %34 {strides = array<i32>} : memref<8x9xf32, #tpu.memory_space<vmem>>, vector<8x9xf32>,
    return
  }
  func.func @transform_0(%arg0: i32) -> (i32, i32) {
    %c0_i32 = arith.constant 0 : i32
    %c0_i32_0 = arith.constant 0 : i32
    return %arg0, %c0_i32 : i32, i32
  }
  func.func @transform_1(%arg0: i32) -> (i32, i32) {
    %c0_i32 = arith.constant 0 : i32
    %c0_i32_0 = arith.constant 0 : i32
    %c0_i32_1 = arith.constant 0 : i32
    return %c0_i32, %c0_i32_0 : i32, i32
  }
  func.func @transform_2(%arg0: i32) -> (i32, i32, i32) {
    %c0_i32 = arith.constant 0 : i32
    %c0_i32_0 = arith.constant 0 : i32
    %c0_i32_1 = arith.constant 0 : i32
    %c0_i32_2 = arith.constant 0 : i32
    return %c0_i32, %c0_i32_0, %c0_i32_1 : i32, i32, i32
  }
  func.func @transform_3(%arg0: i32) -> (i32, i32) {
    %c0_i32 = arith.constant 0 : i32
    %c0_i32_0 = arith.constant 0 : i32
    %c0_i32_1 = arith.constant 0 : i32
    return %c0_i32, %c0_i32_0 : i32, i32
  }
  func.func @transform_4(%arg0: i32) -> (i32, i32) {
    %c0_i32 = arith.constant 0 : i32
    %c0_i32_0 = arith.constant 0 : i32
    return %arg0, %c0_i32 : i32, i32
  }
}

</mosaic_0001>

<bundles_post_ra>
// kernel: net_forward.1
= control target key start
LH: loop header
LB: loop body
LE: loop exit
PB: predicated region body
PF: predicated region fallthrough
CT: control target
= control target key end

     0   :  { %9 = vsyncpa [#allocation3], 0  ;;  %s972_s0 = inlined_call_operand.hbm [shape: f32[8,93], index: 0, kind: input, shape index: {}]   ;;  %s973_s1 = inlined_call_operand.hbm [shape: bf16[93,128], index: 1, kind: input, shape index: {}]   ;;  %s974_s2 = inlined_call_operand.hbm [shape: bf16[3,128,128], index: 2, kind: input, shape index: {}]   ;;  %s975_s3 = inlined_call_operand.hbm [shape: f32[4,128], index: 3, kind: input, shape index: {}]   ;;  %s976_s4 = inlined_call_operand.hbm [shape: f32[8,9], index: 4, kind: output, shape index: {}]  }
   0x1   :  { %10 = vsyncpa [#allocation6], 0 }
   0x2   :  { %11 = vsyncpa [#allocation9], 0 }
   0x3   :  { %12 = vsyncpa [#allocation4], 0  ;;  %s832_s15 = smov [#allocation5]   ;;  %s714_s19 = scalar_lea.hbm %s973_s1, 768 }
   0x4   :  { %s28_s16 = sshll.u32 %s832_s15, 4  ;;  %p715_p0 = scmp.ne.s32.totalorder %s973_s1, %s714_s19  ;;  %s29_s16 = int_to_ptr.vmem [resolvable:$true] %s28_s16 }
   0x5   :  { %p718_p1 = scmp.lt.u32.totalorder %s714_s19, %s973_s1 }
   0x7   :  { %p720_p2 = pnand %p718_p1, %p715_p0 }
   0x9   :  { %723 = shalt.err (!%p720_p2)
}
   0xa   :  { %s724_s24 = scalar_lea.vmem %s29_s16, 768  ;;  %p729_p4 = scmp.lt.s32.totalorder %s29_s16, %s29_s16 }
   0xb   :  { %p725_p3 = scmp.ne.s32.totalorder %s29_s16, %s724_s24  ;;  %p730_p5 = scmp.lt.s32.totalorder %s724_s24, %s724_s24 }
   0xd   :  { %p731_p6 = por %p730_p5, %p729_p4 }
   0xf   :  { %p732_p7 = pnand %p731_p6, %p725_p3 }
  0x11   :  { %735 = shalt.err (!%p732_p7)
}
  0x12   :  { %s833_s25 = smov 64   ;;  %s834_s26 = smov 4  }
  0x13   :  { %34 = dma.hbm_to_vmem [thread:$0]  %s973_s1, 768, %s29_s16, [#allocation6], %s833_s25, %s833_s25, %s834_s26  }
  0x14   :  { %s835_s29 = smov [#allocation2]   ;;  %s836_s5 = smov [#allocation7]  }
  0x15   :  { %s19_s30 = sshll.u32 %s835_s29, 4  ;;  %s40_s6 = sshll.u32 %s836_s5, 4  ;;  %s20_s30 = int_to_ptr.vmem [resolvable:$true] %s19_s30  ;;  %s41_s6 = int_to_ptr.vmem [resolvable:$true] %s40_s6 }
  0x16   :  { %s736_s9 = scalar_lea.hbm %s972_s0, 128 }
  0x17   :  { %p737_p8 = scmp.ne.s32.totalorder %s972_s0, %s736_s9  ;;  %p740_p9 = scmp.lt.u32.totalorder %s736_s9, %s972_s0 }
  0x19   :  { %p742_p10 = pnand %p740_p9, %p737_p8 }
  0x1b   :  { %745 = shalt.err (!%p742_p10)
}
  0x1c   :  { %s746_s1 = scalar_lea.vmem %s20_s30, 128  ;;  %p751_p12 = scmp.lt.s32.totalorder %s20_s30, %s20_s30 }
  0x1d   :  { %p747_p11 = scmp.ne.s32.totalorder %s20_s30, %s746_s1  ;;  %p752_p13 = scmp.lt.s32.totalorder %s746_s1, %s746_s1 }
  0x1f   :  { %p753_p0 = por %p752_p13, %p751_p12 }
  0x21   :  { %p754_p1 = pnand %p753_p0, %p747_p11 }
  0x23   :  { %757 = shalt.err (!%p754_p1)
}
  0x24   :  { %22 = dma.hbm_to_vmem [thread:$0]  %s972_s0, 128, %s20_s30, [#allocation3]  }
  0x25   :  { %s758_s18 = scalar_lea.hbm %s974_s2, 3072 }
  0x26   :  { %p759_p2 = scmp.ne.s32.totalorder %s974_s2, %s758_s18  ;;  %p762_p3 = scmp.lt.u32.totalorder %s758_s18, %s974_s2 }
  0x28   :  { %p764_p4 = pnand %p762_p3, %p759_p2 }
  0x2a   :  { %767 = shalt.err (!%p764_p4)
}
  0x2b   :  { %s768_s23 = scalar_lea.vmem %s41_s6, 3072  ;;  %p773_p6 = scmp.lt.s32.totalorder %s41_s6, %s41_s6 }
  0x2c   :  { %p769_p5 = scmp.ne.s32.totalorder %s41_s6, %s768_s23  ;;  %p774_p7 = scmp.lt.s32.totalorder %s768_s23, %s768_s23 }
  0x2e   :  { %p775_p8 = por %p774_p7, %p773_p6 }
  0x30   :  { %p776_p9 = pnand %p775_p8, %p769_p5 }
  0x32   :  { %779 = shalt.err (!%p776_p9)
}
  0x33   :  { %46 = dma.hbm_to_vmem [thread:$0]  %s974_s2, 3072, %s41_s6, [#allocation6], %s833_s25, %s833_s25, %s834_s26  }
  0x34   :  { %s837_s27 = smov [#allocation8]   ;;  %s780_s5 = scalar_lea.hbm %s975_s3, 64 }
  0x35   :  { %s53_s28 = sshll.u32 %s837_s27, 4  ;;  %p781_p10 = scmp.ne.s32.totalorder %s975_s3, %s780_s5  ;;  %s54_s28 = int_to_ptr.vmem [resolvable:$true] %s53_s28 }
  0x36   :  { %p784_p11 = scmp.lt.u32.totalorder %s780_s5, %s975_s3 }
  0x38   :  { %p786_p12 = pnand %p784_p11, %p781_p10 }
  0x3a   :  { %789 = shalt.err (!%p786_p12)
}
  0x3b   :  { %s790_s11 = scalar_lea.vmem %s54_s28, 64  ;;  %p795_p0 = scmp.lt.s32.totalorder %s54_s28, %s54_s28 }
  0x3c   :  { %p791_p13 = scmp.ne.s32.totalorder %s54_s28, %s790_s11  ;;  %p796_p1 = scmp.lt.s32.totalorder %s790_s11, %s790_s11 }
  0x3e   :  { %p797_p2 = por %p796_p1, %p795_p0 }
  0x40   :  { %p798_p3 = pnand %p797_p2, %p791_p13 }
  0x42   :  { %801 = shalt.err (!%p798_p3)
}
  0x43   :  { %56 = dma.hbm_to_vmem [thread:$0]  %s975_s3, 64, %s54_s28, [#allocation9]  }
  0x44   :  { %824 = dma.done.wait [#allocation3], 128  }
  0x45   :  { %825 = vsyncadd [#allocation3], 4294967168 }
  0x46   :  { %826 = dma.done.wait [#allocation6], 3840  }
  0x47   :  { %827 = vsyncadd [#allocation6], 4294963456 }
  0x48   :  { %828 = dma.done.wait [#allocation9], 64  }
  0x49   :  { %829 = vsyncadd [#allocation9], 4294967232  ;;  %v838_v0 = vmov 0.0   ;;  %vm839_vm0 = vmmov 0   ;;  %v684_v1 = vld [vmem:[#allocation5] sm:$0xff]   ;;  %v685_v2 = vld [vmem:[#allocation5 + $0x8] sm:$0xff]  }
  0x4a   :  { %598 = vmatprep.subr.bf16.mxu0 %v838_v0  ;;  %614 = vmatprep.subr.bf16.mxu1 %v838_v0  ;;  %vm128_vm1 = vcmask 1045504   ;;  %v686_v3 = vld [vmem:[#allocation5 + $0x10] sm:$0xff]   ;;  %vm129_vm2 = vcmask 1046528   ;;  %v840_v5 = vmov 65535   ;;  %v691_v7 = vld [vmem:[#allocation7 + $0x8] sm:$0xff]   ;;  %v688_v9 = vld [vmem:[#allocation5 + $0x20] sm:$0xff]  }
  0x4b   :  { %610 = vmatprep.mubr.msk.bf16.mxu0 %vm839_vm0, %v838_v0  ;;  %630 = vmatprep.mubr.msk.bf16.mxu1 %vm839_vm0, %v838_v0  ;;  %v690_v4 = vld [vmem:[#allocation7] sm:$0xff]   ;;  %v130_v6 = vsel %vm128_vm1, 4294967295, %v840_v5  ;;  %v687_v8 = vld [vmem:[#allocation5 + $0x18] sm:$0xff]   ;;  %v689_v10 = vld [vmem:[#allocation5 + $0x28] sm:$0x7f]   ;;  %vm124_vm3 = vcmask 760832  }
  0x4c   :  { %599 = vmatpush3.bf16.msra.mxu0 %v684_v1  ;;  %615 = vmatpush3.bf16.msra.mxu1 %v690_v4  ;;  %v131_v11 = vsel %vm129_vm2, %v130_v6, 0  ;;  %v692_v12 = vld [vmem:[#allocation7 + $0x10] sm:$0xff]   ;;  %v693_v13 = vld [vmem:[#allocation7 + $0x18] sm:$0xff]   ;;  %v70_v14 = vld [vmem:[#allocation2] sm:$0xff]  ;;  %s841_s3 = smov [#allocation10]   ;;  %vm510_vm4 = vcmask 72704  }
  0x4d   :  { %600 = vmatprep.subr.bf16.mxu0 %v838_v0  ;;  %616 = vmatprep.subr.bf16.mxu1 %v838_v0  ;;  %v133_v15 = vand.u32 %v689_v10, %v131_v11  ;;  %v694_v16 = vld [vmem:[#allocation7 + $0x20] sm:$0xff]   ;;  %v71_v17 = vpack.c.bf16 %v70_v14, %v70_v14  ;;  %v695_v18 = vld [vmem:[#allocation7 + $0x28] sm:$0xff]   ;;  %v696_v19 = vld [vmem:[#allocation7 + $0x30] sm:$0xff]   ;;  %s518_s26 = sshll.u32 %s841_s3, 4  ;;  %s519_s26 = int_to_ptr.vmem [resolvable:$true] %s518_s26 }
  0x4e   :  { %v697_v20 = vld [vmem:[#allocation7 + $0x38] sm:$0xff]   ;;  %v698_v21 = vld [vmem:[#allocation7 + $0x40] sm:$0xff]   ;;  %v699_v22 = vld [vmem:[#allocation7 + $0x48] sm:$0xff]   ;;  %s802_s6 = scalar_lea.vmem %s519_s26, 128  ;;  %p807_p5 = scmp.lt.s32.totalorder %s519_s26, %s519_s26 }
  0x4f   :  { %v700_v23 = vld [vmem:[#allocation7 + $0x50] sm:$0xff]   ;;  %v701_v24 = vld [vmem:[#allocation7 + $0x58] sm:$0xff]   ;;  %v702_v25 = vld [vmem:[#allocation7 + $0x60] sm:$0xff]   ;;  %p803_p4 = scmp.ne.s32.totalorder %s519_s26, %s802_s6  ;;  %p808_p6 = scmp.lt.s32.totalorder %s802_s6, %s802_s6 }
  0x50   :  { %601 = vmatpush3.bf16.msra.mxu0 %v685_v2  ;;  %617 = vmatpush3.bf16.msra.mxu1 %v691_v7  ;;  %v703_v26 = vld [vmem:[#allocation7 + $0x68] sm:$0xff]   ;;  %v529_v27 = vld [vmem:[#allocation8] ss:$0 sm:$0xff]  ;;  %v704_v35 = vld [vmem:[#allocation7 + $0x70] sm:$0xff]  }
  0x51   :  { %602 = vmatprep.subr.bf16.mxu0 %v838_v0  ;;  %618 = vmatprep.subr.bf16.mxu1 %v838_v0  ;;  %v705_v36 = vld [vmem:[#allocation7 + $0x78] sm:$0xff]   ;;  %v706_v37 = vld [vmem:[#allocation7 + $0x80] sm:$0xff]   ;;  %v707_v38 = vld [vmem:[#allocation7 + $0x88] sm:$0xff]   ;;  %p809_p7 = por %p808_p6, %p807_p5 }
  0x52   :  { %v708_v39 = vld [vmem:[#allocation7 + $0x90] sm:$0xff]   ;;  %v709_v40 = vld [vmem:[#allocation7 + $0x98] sm:$0xff]   ;;  %v710_v41 = vld [vmem:[#allocation7 + $0xa0] sm:$0xff]  }
  0x53   :  { %v711_v42 = vld [vmem:[#allocation7 + $0xa8] sm:$0xff]   ;;  %v537_v43 = vld [vmem:[#allocation8 + $0x1] ss:$0 sm:$0xff]  ;;  %v712_v51 = vld [vmem:[#allocation7 + $0xb0] sm:$0xff]   ;;  %p810_p8 = pnand %p809_p7, %p803_p4 }
  0x54   :  { %603 = vmatpush3.bf16.msra.mxu0 %v686_v3  ;;  %619 = vmatpush3.bf16.msra.mxu1 %v692_v12  ;;  %v713_v52 = vld [vmem:[#allocation7 + $0xb8] sm:$0xff]   ;;  %v546_v53 = vld [vmem:[#allocation8 + $0x2] ss:$0 sm:$0xff]  ;;  %v555_v61 = vld [vmem:[#allocation8 + $0x3] ss:$0 sm:$0xff] }
  0x55   :  { %604 = vmatprep.subr.bf16.mxu0 %v838_v0  ;;  %620 = vmatprep.subr.bf16.mxu1 %v838_v0 }
  0x58   :  { %605 = vmatpush3.bf16.msra.mxu0 %v687_v8  ;;  %621 = vmatpush3.bf16.msra.mxu1 %v693_v13 }
  0x59   :  { %606 = vmatprep.subr.bf16.mxu0 %v838_v0  ;;  %622 = vmatprep.subr.bf16.mxu1 %v838_v0 }
  0x5c   :  { %607 = vmatpush3.bf16.msra.mxu0 %v688_v9  ;;  %623 = vmatpush3.bf16.msra.mxu1 %v694_v16 }
  0x5d   :  { %608 = vmatprep.subr.bf16.mxu0 %v838_v0  ;;  %624 = vmatprep.subr.bf16.mxu1 %v838_v0 }
  0x60   :  { %609 = vmatpush3.bf16.msra.mxu0 %v133_v15  ;;  %625 = vmatpush3.bf16.msra.mxu1 %v695_v18 }
  0x61   :  { %634 = vmatprep.subr.bf16.mxu0 %v838_v0  ;;  %626 = vmatprep.subr.bf16.mxu1 %v838_v0 }
  0x63   :  { %611 = vmatmul.mubr.msk.bf16.vlgmr.msra.gmra.mrb[0].mxu0 %vm124_vm3, %v71_v17 }
  0x64   :  { %650 = vmatprep.mubr.msk.bf16.mxu0 %vm839_vm0, %v838_v0  ;;  %627 = vmatpush3.bf16.msra.mxu1 %v696_v19 }
  0x65   :  { %628 = vmatprep.subr.bf16.mxu1 %v838_v0  ;;  %635 = vmatpush3.bf16.msra.mxu0 %v698_v21 }
  0x66   :  { %636 = vmatprep.subr.bf16.mxu0 %v838_v0 }
  0x68   :  { %629 = vmatpush3.bf16.msra.mxu1 %v697_v20 }
  0x69   :  { %654 = vmatprep.subr.bf16.mxu1 %v838_v0  ;;  %637 = vmatpush3.bf16.msra.mxu0 %v699_v22 }
  0x6a   :  { %638 = vmatprep.subr.bf16.mxu0 %v838_v0 }
  0x6d   :  { %639 = vmatpush3.bf16.msra.mxu0 %v700_v23 }
  0x6e   :  { %640 = vmatprep.subr.bf16.mxu0 %v838_v0 }
  0x71   :  { %641 = vmatpush3.bf16.msra.mxu0 %v701_v24 }
  0x72   :  { %642 = vmatprep.subr.bf16.mxu0 %v838_v0 }
  0x75   :  { %643 = vmatpush3.bf16.msra.mxu0 %v702_v25 }
  0x76   :  { %644 = vmatprep.subr.bf16.mxu0 %v838_v0 }
  0x79   :  { %645 = vmatpush3.bf16.msra.mxu0 %v703_v26 }
  0x7a   :  { %646 = vmatprep.subr.bf16.mxu0 %v838_v0 }
  0x7d   :  { %647 = vmatpush3.bf16.msra.mxu0 %v704_v35 }
  0x7e   :  { %648 = vmatprep.subr.bf16.mxu0 %v838_v0 }
  0x81   :  { %649 = vmatpush3.bf16.msra.mxu0 %v705_v36 }
 0x136   :  { %v169_v28 = vpop.f32.mrb[0].mxu0 }
 0x137   :  { %v170_v29 = vadd.f32 %v529_v27, %v169_v28  ;;  %v612_v30 = vpop.f32.mrb[1].mxu0 }
 0x138   :  { %v172_v31 = vpop.f32.mrb[2].mxu0 }
 0x139   :  { %v175_v32 = vmax.f32 %v170_v29, 0.0  ;;  %v613_v33 = vpop.f32.mrb[3].mxu0 }
 0x13b   :  { %v176_v34 = vpack.c.bf16 %v175_v32, %v175_v32 }
 0x13d   :  { %631 = vmatmul.mubr.bf16.vlgmr.msra.gmra.mrb[0].mxu1 %v176_v34 }
 0x13e   :  { %670 = vmatprep.mubr.msk.bf16.mxu1 %vm839_vm0, %v838_v0  ;;  %655 = vmatpush3.bf16.msra.mxu1 %v706_v37 }
 0x13f   :  { %656 = vmatprep.subr.bf16.mxu1 %v838_v0 }
 0x142   :  { %657 = vmatpush3.bf16.msra.mxu1 %v707_v38 }
 0x143   :  { %658 = vmatprep.subr.bf16.mxu1 %v838_v0 }
 0x146   :  { %659 = vmatpush3.bf16.msra.mxu1 %v708_v39 }
 0x147   :  { %660 = vmatprep.subr.bf16.mxu1 %v838_v0 }
 0x14a   :  { %661 = vmatpush3.bf16.msra.mxu1 %v709_v40 }
 0x14b   :  { %662 = vmatprep.subr.bf16.mxu1 %v838_v0 }
 0x14e   :  { %663 = vmatpush3.bf16.msra.mxu1 %v710_v41 }
 0x14f   :  { %664 = vmatprep.subr.bf16.mxu1 %v838_v0 }
 0x152   :  { %665 = vmatpush3.bf16.msra.mxu1 %v711_v42 }
 0x153   :  { %666 = vmatprep.subr.bf16.mxu1 %v838_v0 }
 0x156   :  { %667 = vmatpush3.bf16.msra.mxu1 %v712_v51 }
 0x157   :  { %668 = vmatprep.subr.bf16.mxu1 %v838_v0 }
 0x15a   :  { %669 = vmatpush3.bf16.msra.mxu1 %v713_v52 }
 0x210   :  { %v280_v44 = vpop.f32.mrb[0].mxu1 }
 0x211   :  { %v281_v45 = vadd.f32 %v537_v43, %v280_v44  ;;  %v632_v46 = vpop.f32.mrb[1].mxu1 }
 0x212   :  { %v283_v47 = vpop.f32.mrb[2].mxu1 }
 0x213   :  { %v286_v48 = vmax.f32 %v281_v45, 0.0  ;;  %v633_v49 = vpop.f32.mrb[3].mxu1 }
 0x215   :  { %v287_v50 = vpack.c.bf16 %v286_v48, %v286_v48 }
 0x217   :  { %651 = vmatmul.mubr.bf16.vlgmr.msra.gmra.mrb[4].mxu0 %v287_v50 }
 0x2ea   :  { %v392_v54 = vpop.f32.mrb[4].mxu0 }
 0x2eb   :  { %v393_v55 = vadd.f32 %v546_v53, %v392_v54  ;;  %v652_v56 = vpop.f32.mrb[5].mxu0 }
 0x2ec   :  { %v395_v57 = vpop.f32.mrb[6].mxu0 }
 0x2ed   :  { %v398_v58 = vmax.f32 %v393_v55, 0.0  ;;  %v653_v59 = vpop.f32.mrb[7].mxu0 }
 0x2ef   :  { %v399_v60 = vpack.c.bf16 %v398_v58, %v398_v58 }
 0x2f1   :  { %671 = vmatmul.mubr.bf16.vlgmr.msra.gmra.mrb[4].mxu1 %v399_v60 }
 0x3c4   :  { %v504_v62 = vpop.f32.mrb[4].mxu1 }
 0x3c5   :  { %v505_v63 = vadd.f32 %v555_v61, %v504_v62  ;;  %v672_v1 = vpop.f32.mrb[5].mxu1 }
 0x3c6   :  { %v507_v0 = vpop.f32.mrb[6].mxu1 }
 0x3c7   :  { %v673_v2 = vpop.f32.mrb[7].mxu1  ;;  %511 = vst.msk [vmem:[#allocation10] sm:$0xff] %vm510_vm4, %v505_v63 }
 0x3c8   :  { %813 = shalt.err (!%p810_p8)
}
 0x3c9   :  { %s814_s1 = scalar_lea.hbm %s976_s4, 128 }
 0x3ca   :  { %p815_p9 = scmp.ne.s32.totalorder %s976_s4, %s814_s1  ;;  %p818_p10 = scmp.lt.u32.totalorder %s814_s1, %s976_s4 }
 0x3cc   :  { %p820_p11 = pnand %p818_p10, %p815_p9 }
 0x3ce   :  { %823 = shalt.err (!%p820_p11)
}
 0x3cf   :  { %521 = dma.vmem_to_hbm [thread:$0]  %s519_s26, 128, %s976_s4, [#allocation4]  }
 0x3d0   :  { %830 = dma.done.wait [#allocation4], 128  }
 0x3d1   :  { %831 = vsyncadd [#allocation4], 4294967168 }
 0x3d2   :  { %525 = vsyncpa [#allocation3], 1 }
 0x3d3   :  { %526 = vsyncpa [#allocation6], 1 }
 0x3d4   :  { %527 = vsyncpa [#allocation9], 1 }
 0x3d5   :  { %528 = vsyncpa [#allocation4], 1 }

</bundles_post_ra>
